<compile_context>
chip_gen: v7x
topology: tpu7x:2x2x1
jax: 0.10.0
libtpu: 0.0.40
codegen_flags: <defaults>
</compile_context>

<pallas_src>
import jax
import jax.numpy as jnp
from jax.experimental import pallas as pl
from jax.experimental.pallas import tpu as pltpu


def mlp_kernel(x_ref, cols_ref, w2_ref, b3_ref, o_ref):
    # x_ref   : (1, TB)   batch on lanes (f32)
    # cols_ref: (W, 4)    packed columns [w1 | b1 | b2 | w3] (f32)
    # w2_ref  : (W, W)    layer-2 weight (f32 or bf16)
    # b3_ref  : (1, 1)    layer-3 bias (f32)
    # o_ref   : (1, TB)   output (f32)
    act_dt = w2_ref.dtype  # activation/tanh dtype follows the matmul dtype

    x = x_ref[...]                                  # (1, TB)
    cols = cols_ref[...]                            # (W, 4)
    w1 = cols[:, 0:1]
    b1 = cols[:, 1:2]
    b2 = cols[:, 2:3]
    w3 = cols[:, 3:4]

    # Layer 1 (K=1): rank-1 outer product on the VPU, tanh on the EUP.
    h1 = jnp.tanh((w1 * x + b1).astype(act_dt))                      # (W, TB)

    # Layer 2: the only real contraction -> MXU, f32 accumulation.
    z2 = jnp.dot(w2_ref[...], h1, preferred_element_type=jnp.float32) + b2
    h2 = jnp.tanh(z2.astype(act_dt)).astype(jnp.float32)             # (W, TB)

    # Layer 3 (N=1): VPU multiply + sublane (XLU) reduce, lane-dense output.
    o_ref[...] = jnp.sum(w3 * h2, axis=0, keepdims=True) + b3_ref[...]


def _resident_spec(shape, index_map):
    """Constant-index (fetched-once) operand: single VMEM buffer if supported."""
    try:
        return pl.BlockSpec(shape, index_map, pipeline_mode=pl.Buffered(1))
    except (TypeError, AttributeError):  # older jax without pipeline_mode
        return pl.BlockSpec(shape, index_map)


def mlp_forward(x, params, *, block_batch=4096, matmul_dtype=jnp.float32):
    """Fused 3-layer MLP forward.

    x: (B, 1) float32
    params: PyTorch-layout dict:
        w1 (W, 1), b1 (W,), w2 (W, W), b2 (W,), w3 (1, W), b3 (1,)
    returns: (B, 1) float32
    """
    B = x.shape[0]
    W = params["w2"].shape[0]
    lane = 128

    # ---- batch tiling: lane-dense tiles, no wrapper-side pad/copy ----------
    if B <= lane:
        tb = B  # single block == full array (no edge masking needed)
    else:
        bb = max(lane, (int(block_batch) // lane) * lane)      # cap, mult of 128
        tb = min(bb, ((B + lane - 1) // lane) * lane)
        # v7x has 2 TensorCores: keep >= 2 grid steps when the batch allows.
        if -(-B // tb) < 2:
            tb = max(lane, ((-(-B // 2) + lane - 1) // lane) * lane)
    grid = (-(-B // tb),)

    x_t = x.reshape(1, B).astype(jnp.float32)  # free reshape: batch -> lanes

    # ---- weights: PyTorch layout -> kernel layout ---------------------------
    # Pack the four column operands into one (W, 4) block: one DMA + one
    # lane-padded VMEM buffer instead of four.
    cols = jnp.stack(
        [
            params["w1"].reshape(W),
            params["b1"].reshape(W),
            params["b2"].reshape(W),
            params["w3"].reshape(W),
        ],
        axis=1,
    ).astype(jnp.float32)                                        # (W, 4)
    w2m = params["w2"].astype(matmul_dtype)                      # (W, W), y = w2 @ h
    b3c = params["b3"].reshape(1, 1).astype(jnp.float32)

    const = lambda i: (0, 0)  # weights/biases: fetched once, VMEM-resident

    out = pl.pallas_call(
        mlp_kernel,
        out_shape=jax.ShapeDtypeStruct((1, B), jnp.float32),
        grid_spec=pltpu.PrefetchScalarGridSpec(
            num_scalar_prefetch=0,
            grid=grid,
            in_specs=[
                pl.BlockSpec((1, tb), lambda i: (0, i)),   # x tile (lane-dense)
                _resident_spec((W, 4), const),             # packed w1|b1|b2|w3
                _resident_spec((W, W), const),             # w2
                _resident_spec((1, 1), const),             # b3
            ],
            out_specs=pl.BlockSpec((1, tb), lambda i: (0, i)),
        ),
        compiler_params=pltpu.CompilerParams(
            # Batch tiles are independent -> megacore-shardable on v7x.
            dimension_semantics=("parallel",),
            # For W >= ~1024 also pass matmul_dtype=jnp.bfloat16 and, if
            # needed, vmem_limit_bytes=... here; unnecessary at demo sizes.
        ),
    )(x_t, cols, w2m, b3c)

    return out.reshape(B, 1)


def init_params(key, width):
    """PyTorch-layout params with nn.Linear's U(-1/sqrt(fan_in), ...) init."""
    ks = jax.random.split(key, 6)

    def uniform(k, shape, fan_in):
        bound = 1.0 / (fan_in ** 0.5)
        return jax.random.uniform(k, shape, jnp.float32, -bound, bound)

    return {
        "w1": uniform(ks[0], (width, 1), 1),        # (out, in)
        "b1": uniform(ks[1], (width,), 1),
        "w2": uniform(ks[2], (width, width), width),
        "b2": uniform(ks[3], (width,), width),
        "w3": uniform(ks[4], (1, width), width),
        "b3": uniform(ks[5], (1,), width),
    }


def mlp_reference(x, p):
    """Pure-JAX reference matching PyTorch nn.Linear semantics (y = x W^T + b)."""
    h1 = jnp.tanh(x @ p["w1"].T + p["b1"])
    h2 = jnp.tanh(h1 @ p["w2"].T + p["b2"])
    return h2 @ p["w3"].T + p["b3"]


if __name__ == "__main__":
    key = jax.random.PRNGKey(0)
    k_x, k_p = jax.random.split(key)

    width = 32
    params = init_params(k_p, width)

    fwd = jax.jit(mlp_forward, static_argnames=("block_batch", "matmul_dtype"))

    # Small single-block case (block == full array).
    x = jax.random.normal(k_x, (8, 1), jnp.float32)
    out = jax.block_until_ready(fwd(x, params))
    ref = mlp_reference(x, params)
    assert out.shape == (8, 1)
    assert jnp.allclose(out, ref, atol=1e-5, rtol=1e-5)

    # Multi-block grid with a partial (masked) edge block, default big tile.
    x2 = jax.random.normal(k_x, (300, 1), jnp.float32)
    out2 = jax.block_until_ready(fwd(x2, params))
    ref2 = mlp_reference(x2, params)
    assert out2.shape == (300, 1)
    assert jnp.allclose(out2, ref2, atol=1e-5, rtol=1e-5)

    # Small explicit tile -> several grid steps (exercises the pipelined path).
    out3 = jax.block_until_ready(fwd(x2, params, block_batch=128))
    assert jnp.allclose(out3, ref2, atol=1e-5, rtol=1e-5)

    # bf16 MXU / EUP fast path (looser tolerance vs the f32 reference).
    out4 = jax.block_until_ready(fwd(x2, params, matmul_dtype=jnp.bfloat16))
    assert jnp.allclose(out4, ref2, atol=1e-1, rtol=1e-1)

    print("KERNEL_OK")
</pallas_src>

<mosaic_0001>
module attributes {stable_mosaic.version = 11 : i64} {
  func.func @mlp_kernel(%arg0: i32, %arg1: memref<1x8xf32, #tpu.memory_space<vmem>>, %arg2: memref<32x4xf32, #tpu.memory_space<vmem>>, %arg3: memref<32x32xf32, #tpu.memory_space<vmem>>, %arg4: memref<1x1xf32, #tpu.memory_space<vmem>>, %arg5: memref<1x8xf32, #tpu.memory_space<vmem>>) attributes {dimension_semantics = [#tpu.dimension_semantics<parallel>], iteration_bounds = array<i64: 1>, scalar_prefetch = 0 : i64, scratch_operands = 0 : i64, tpu.core_type = #tpu.core_type<tc>, window_params = [{transform_indices = @transform_0, window_bounds = array<i64: 1, 8>}, {pipeline_mode = #tpu.pipeline_mode<synchronous>, transform_indices = @transform_1, window_bounds = array<i64: 32, 4>}, {pipeline_mode = #tpu.pipeline_mode<synchronous>, transform_indices = @transform_2, window_bounds = array<i64: 32, 32>}, {pipeline_mode = #tpu.pipeline_mode<synchronous>, transform_indices = @transform_3, window_bounds = array<i64: 1, 1>}, {transform_indices = @transform_4, window_bounds = array<i64: 1, 8>}]} {
    %c0 = arith.constant 0 : index
    %c0_0 = arith.constant 0 : index
    %0 = vector.load %arg1[%c0, %c0_0] : memref<1x8xf32, #tpu.memory_space<vmem>>, vector<1x8xf32>
    %c0_1 = arith.constant 0 : index
    %c0_2 = arith.constant 0 : index
    %1 = vector.load %arg2[%c0_1, %c0_2] : memref<32x4xf32, #tpu.memory_space<vmem>>, vector<32x4xf32>
    %2 = vector.extract_strided_slice %1 {offsets = [0, 0], sizes = [32, 1], strides = [1, 1]} : vector<32x4xf32> to vector<32x1xf32>
    %3 = vector.extract_strided_slice %1 {offsets = [0, 1], sizes = [32, 1], strides = [1, 1]} : vector<32x4xf32> to vector<32x1xf32>
    %4 = vector.extract_strided_slice %1 {offsets = [0, 2], sizes = [32, 1], strides = [1, 1]} : vector<32x4xf32> to vector<32x1xf32>
    %5 = vector.extract_strided_slice %1 {offsets = [0, 3], sizes = [32, 1], strides = [1, 1]} : vector<32x4xf32> to vector<32x1xf32>
    %6 = vector.broadcast %2 : vector<32x1xf32> to vector<32x8xf32>
    %7 = vector.broadcast %0 : vector<1x8xf32> to vector<32x8xf32>
    %8 = arith.mulf %6, %7 : vector<32x8xf32>
    %9 = vector.broadcast %3 : vector<32x1xf32> to vector<32x8xf32>
    %10 = arith.addf %8, %9 : vector<32x8xf32>
    %11 = math.tanh %10 : vector<32x8xf32>
    %c0_3 = arith.constant 0 : index
    %c0_4 = arith.constant 0 : index
    %12 = vector.load %arg3[%c0_3, %c0_4] : memref<32x32xf32, #tpu.memory_space<vmem>>, vector<32x32xf32>
    %cst = arith.constant dense<0.000000e+00> : vector<32x8xf32>
    %13 = tpu.matmul %12, %11, %cst {dimension_numbers = #tpu.dot_dimension_numbers<[1], [0], [0], [1], [0, 0, 1, 1], [], []>} : vector<32x32xf32>, vector<32x8xf32>, vector<32x8xf32> -> vector<32x8xf32>
    %14 = vector.broadcast %4 : vector<32x1xf32> to vector<32x8xf32>
    %15 = arith.addf %13, %14 : vector<32x8xf32>
    %16 = math.tanh %15 : vector<32x8xf32>
    %17 = vector.broadcast %5 : vector<32x1xf32> to vector<32x8xf32>
    %18 = arith.mulf %17, %16 : vector<32x8xf32>
    %cst_5 = arith.constant dense<0.000000e+00> : vector<8xf32>
    %19 = vector.multi_reduction <add>, %18, %cst_5 [0] : vector<32x8xf32> to vector<8xf32>
    %20 = vector.shape_cast %19 : vector<8xf32> to vector<1x8xf32>
    %c0_6 = arith.constant 0 : index
    %c0_7 = arith.constant 0 : index
    %21 = vector.load %arg4[%c0_6, %c0_7] : memref<1x1xf32, #tpu.memory_space<vmem>>, vector<1x1xf32>
    %22 = vector.broadcast %21 : vector<1x1xf32> to vector<1x8xf32>
    %23 = arith.addf %20, %22 : vector<1x8xf32>
    %c0_8 = arith.constant 0 : index
    %c0_9 = arith.constant 0 : index
    %24 = vector.load %arg5[%c0_8, %c0_9] : memref<1x8xf32, #tpu.memory_space<vmem>>, vector<1x8xf32>
    tpu.vector_store %arg5[%c0_8, %c0_9], %23 {strides = array<i32>} : memref<1x8xf32, #tpu.memory_space<vmem>>, vector<1x8xf32>,
    return
  }
  func.func @transform_0(%arg0: i32) -> (i32, i32) {
    %c0_i32 = arith.constant 0 : i32
    %c0_i32_0 = arith.constant 0 : i32
    return %c0_i32, %arg0 : i32, i32
  }
  func.func @transform_1(%arg0: i32) -> (i32, i32) {
    %c0_i32 = arith.constant 0 : i32
    %c0_i32_0 = arith.constant 0 : i32
    %c0_i32_1 = arith.constant 0 : i32
    return %c0_i32, %c0_i32_0 : i32, i32
  }
  func.func @transform_2(%arg0: i32) -> (i32, i32) {
    %c0_i32 = arith.constant 0 : i32
    %c0_i32_0 = arith.constant 0 : i32
    %c0_i32_1 = arith.constant 0 : i32
    return %c0_i32, %c0_i32_0 : i32, i32
  }
  func.func @transform_3(%arg0: i32) -> (i32, i32) {
    %c0_i32 = arith.constant 0 : i32
    %c0_i32_0 = arith.constant 0 : i32
    %c0_i32_1 = arith.constant 0 : i32
    return %c0_i32, %c0_i32_0 : i32, i32
  }
  func.func @transform_4(%arg0: i32) -> (i32, i32) {
    %c0_i32 = arith.constant 0 : i32
    %c0_i32_0 = arith.constant 0 : i32
    return %c0_i32, %arg0 : i32, i32
  }
}

</mosaic_0001>

<bundles_post_ra>
// kernel: mlp_forward.1
= control target key start
LH: loop header
LB: loop body
LE: loop exit
PB: predicated region body
PF: predicated region fallthrough
CT: control target
= control target key end

     0   :  { %s437_s0 = inlined_call_operand.vmem [shape: f32[1,8], index: 0, kind: input, shape index: {}]   ;;  %s438_s1 = inlined_call_operand.vmem [shape: f32[32,4], index: 1, kind: input, shape index: {}]   ;;  %s439_s2 = inlined_call_operand.vmem [shape: f32[32,32], index: 2, kind: input, shape index: {}]   ;;  %s440_s3 = inlined_call_operand.<no memory space> [shape: f32[1,1], index: 3, kind: input, shape index: {}]   ;;  %s441_s4 = inlined_call_operand.hbm [shape: f32[1,8], index: 4, kind: output, shape index: {}]  }
   0x1   :  { %v9_v0 = vstv %s440_s3 }
   0x2   :  { %10 = vst [vmem:[#allocation2] sm:$0x1] %v9_v0 }
   0x3   :  { %v21_v1 = vld [vmem:[%s438_s1] sm:$0xff]  ;;  %v357_v2 = vmov 1   ;;  %v358_v3 = vmov 0  }
   0x4   :  { %307 = vset.pattern.permute.xlu1 %v357_v2  ;;  %306 = vset.pattern.permute.xlu0 %v358_v3 }
   0x5   :  { %11 = vsyncpa [#allocation4], 0  ;;  %56 = vperm.xlu1 %307, %v21_v1   ;;  %27 = vperm.xlu0 %306, %v21_v1   ;;  %v22_v4 = vld [vmem:[%s438_s1 + $0x8] sm:$0xff]  ;;  %v23_v5 = vld [vmem:[%s438_s1 + $0x10] sm:$0xff]  ;;  %vm99_vm0 = vcmask 261120   ;;  %v359_v9 = vmov 2  }
   0x6   :  { %v24_v6 = vld [vmem:[%s438_s1 + $0x18] sm:$0xff]  ;;  %v79_v7 = vld [vmem:[%s439_s2] sm:$0xff]  ;;  %v81_v8 = vld [vmem:[%s439_s2 + $0x10] sm:$0xff]  ;;  %v360_v10 = vmov 3   ;;  %vm221_vm1 = vcmask 64512   ;;  %vm246_vm2 = vcmask 57344  }
   0x7   :  { %283 = vmatprep.mubr.msk.f32.mxu0 %vm99_vm0, %v79_v7  ;;  %286 = vmatprep.mubr.msk.f32.mxu1 %vm99_vm0, %v81_v8  ;;  %v262_v12 = vld [vmem:[%s437_s0] ss:$0 sm:$0xff]  ;;  %v80_v35 = vld [vmem:[%s439_s2 + $0x8] sm:$0xff]  ;;  %v82_v36 = vld [vmem:[%s439_s2 + $0x18] sm:$0xff]  ;;  %s361_s2 = smov [#allocation3]  }
   0x8   :  { %s254_s6 = sshll.u32 %s361_s2, 4  ;;  %s255_s6 = int_to_ptr.vmem [resolvable:$true] %s254_s6 }
   0x9   :  { %60 = vperm.xlu1 %307, %v22_v4   ;;  %32 = vperm.xlu0 %306, %v22_v4   ;;  %v235_v11 = vld [vmem:[#allocation2] sm:$0x1]  ;;  %s333_s7 = scalar_lea.vmem %s255_s6, 16  ;;  %s337_s8 = scalar_lea.vmem %s255_s6, 32 }
   0xa   :  { %p334_p0 = scmp.ne.s32.totalorder %s255_s6, %s333_s7  ;;  %p338_p1 = scmp.lt.s32.totalorder %s255_s6, %s255_s6 }
   0xb   :  { %p339_p2 = scmp.lt.s32.totalorder %s337_s8, %s333_s7 }
   0xd   :  { %308 = vset.pattern.permute.xlu1 %v358_v3  ;;  %37 = vperm.xlu0 %306, %v23_v5   ;;  %p340_p3 = por %p339_p2, %p338_p1 }
   0xe   :  { %42 = vperm.xlu1 %308, %v24_v6  }
   0xf   :  { %p341_p4 = pnand %p340_p3, %p334_p0 }
  0x11   :  { %309 = vset.pattern.permute.xlu0 %v357_v2 }
  0x12   :  { %310 = vset.pattern.permute.xlu1 %v357_v2  ;;  %64 = vperm.xlu0 %309, %v23_v5   ;;  %v241_v2 = vlaneseq }
  0x13   :  { %68 = vperm.xlu1 %310, %v24_v6  }
  0x16   :  { %312 = vset.pattern.permute.xlu0 %v359_v9 }
  0x17   :  { %311 = vset.pattern.permute.xlu1 %v359_v9  ;;  %88 = vperm.xlu0 %312, %v22_v4  }
  0x18   :  { %84 = vperm.xlu1 %311, %v21_v1  }
  0x1b   :  { %313 = vset.pattern.permute.xlu0 %v360_v10 }
  0x1c   :  { %92 = vperm.xlu1 %311, %v23_v5   ;;  %202 = vperm.xlu0 %313, %v21_v1  }
  0x20   :  { %96 = vperm.xlu1 %311, %v24_v6   ;;  %214 = vperm.xlu0 %313, %v24_v6   ;;  %v242_v6 = vshrl.u32 %v241_v2, 7 }
  0x22   :  { %v243_v9 = vsub.s32 0, %v242_v6 }
  0x24   :  { %314 = vset.pattern.permute.xlu1 %v360_v10  ;;  %316 = vset.pattern.permute.xlu0 %v358_v3 }
  0x25   :  { %206 = vperm.xlu1 %314, %v22_v4  }
  0x29   :  { %210 = vperm.xlu1 %314, %v23_v5  }
  0x2d   :  { %315 = vset.pattern.permute.xlu1 %v358_v3 }
  0x2e   :  { %238 = vperm.xlu1 %315, %v235_v11  }
  0x84   :  { %v57_v13 = vpop.permute.xlu1 %56  ;;  %v28_v14 = vpop.permute.xlu0 %27 }
  0x85   :  { %v51_v15 = vmul.f32 %v262_v12, %v28_v14 }
  0x87   :  { %v71_v16 = vadd.f32 %v57_v13, %v51_v15 }
  0x88   :  { %v61_v17 = vpop.permute.xlu1 %60  ;;  %v33_v18 = vpop.permute.xlu0 %32 }
  0x89   :  { %v52_v19 = vmul.f32 %v262_v12, %v33_v18  ;;  %317 = vtanh.f32 %v71_v16 }
  0x8b   :  { %v72_v20 = vadd.f32 %v61_v17, %v52_v19 }
  0x8c   :  { %v38_v21 = vpop.permute.xlu0 %37 }
  0x8d   :  { %319 = vtanh.f32 %v72_v20  ;;  %v43_v22 = vpop.permute.xlu1 %42  ;;  %v53_v23 = vmul.f32 %v262_v12, %v38_v21 }
  0x8e   :  { %v54_v24 = vmul.f32 %v262_v12, %v43_v22 }
  0x91   :  { %v65_v25 = vpop.permute.xlu0 %64 }
  0x92   :  { %v73_v26 = vadd.f32 %v65_v25, %v53_v23  ;;  %v69_v27 = vpop.permute.xlu1 %68 }
  0x93   :  { %v74_v28 = vadd.f32 %v69_v27, %v54_v24  ;;  %v318_v29 = vpop.eup %317 }
  0x94   :  { %321 = vtanh.f32 %v73_v26 }
  0x95   :  { %323 = vtanh.f32 %v74_v28 }
  0x96   :  { %v89_v39 = vpop.permute.xlu0 %88 }
  0x97   :  { %v320_v30 = vpop.eup %319  ;;  %v85_v37 = vpop.permute.xlu1 %84 }
  0x98   :  { %v289_v31 = vpack.c.bf16 %v320_v30, %v318_v29 }
  0x9a   :  { %290 = vmatprep.subr.bf16.mxu0 %v289_v31  ;;  %297 = vmatprep.subr.bf16.mxu1 %v289_v31 }
  0x9b   :  { %292 = vmatpush3.bf16.msra.mxu0 %v289_v31  ;;  %299 = vmatpush3.bf16.msra.mxu1 %v289_v31  ;;  %v93_v38 = vpop.permute.xlu1 %92  ;;  %v203_v49 = vpop.permute.xlu0 %202 }
  0x9e   :  { %v322_v32 = vpop.eup %321 }
  0x9f   :  { %v324_v33 = vpop.eup %323  ;;  %v97_v40 = vpop.permute.xlu1 %96 }
  0xa0   :  { %v293_v34 = vpack.c.bf16 %v324_v33, %v322_v32  ;;  %v215_v55 = vpop.permute.xlu0 %214 }
  0xa2   :  { %294 = vmatprep.subr.bf16.mxu0 %v293_v34  ;;  %298 = vmatprep.subr.bf16.mxu1 %v293_v34 }
  0xa3   :  { %296 = vmatpush3.bf16.msra.mxu0 %v293_v34  ;;  %300 = vmatpush3.bf16.msra.mxu1 %v293_v34 }
  0xa4   :  { %v207_v50 = vpop.permute.xlu1 %206 }
  0xa6   :  { %284 = vmatmul.mubr.msk.f32.vlgmr.msra.gmra.mrb[0].mxu0 %vm99_vm0, %v80_v35  ;;  %287 = vmatmul.mubr.msk.f32.vlgmr.msra.gmra.mrb[0].mxu1 %vm99_vm0, %v82_v36 }
  0xa8   :  { %v211_v59 = vpop.permute.xlu1 %210 }
  0xad   :  { %v239_v10 = vpop.permute.xlu1 %238 }
  0xae   :  { %v244_v13 = vrot.slane %v239_v10, %v243_v9 }
 0x179   :  { %v285_v41 = vpop.f32.mrb[0].mxu0  ;;  %v288_v42 = vpop.f32.mrb[0].mxu1 }
 0x17a   :  { %v184_v43 = vadd.f32 %v285_v41, %v89_v39  ;;  %v194_v44 = vadd.f32 %v288_v42, %v97_v40  ;;  %v178_v45 = vpop.f32.mrb[1].mxu0  ;;  %v188_v46 = vpop.f32.mrb[1].mxu1 }
 0x17b   :  { %v179_v47 = vadd.f32 %v178_v45, %v85_v37  ;;  %v189_v48 = vadd.f32 %v188_v46, %v93_v38 }
 0x17c   :  { %325 = vtanh.f32 %v184_v43 }
 0x17d   :  { %327 = vtanh.f32 %v194_v44 }
 0x17e   :  { %329 = vtanh.f32 %v179_v47 }
 0x17f   :  { %331 = vtanh.f32 %v189_v48 }
 0x186   :  { %v326_v51 = vpop.eup %325 }
 0x187   :  { %v328_v52 = vpop.eup %327  ;;  %v218_v53 = vmul.f32 %v326_v51, %v207_v50 }
 0x188   :  { %v330_v54 = vpop.eup %329  ;;  %v220_v62 = vmul.f32 %v328_v52, %v215_v55 }
 0x189   :  { %v332_v56 = vpop.eup %331  ;;  %v223_v57 = vsel %vm221_vm1, %v218_v53, 0.0  ;;  %v217_v58 = vmul.f32 %v330_v54, %v203_v49 }
 0x18a   :  { %v219_v60 = vmul.f32 %v332_v56, %v211_v59  ;;  %v227_v3 = vsel %vm221_vm1, %v220_v62, 0.0 }
 0x18b   :  { %v222_v61 = vsel %vm221_vm1, %v217_v58, 0.0 }
 0x18c   :  { %v224_v63 = vadd.f32 %v223_v57, %v222_v61  ;;  %v225_v0 = vsel %vm221_vm1, %v219_v60, 0.0 }
 0x18e   :  { %v226_v1 = vadd.f32 %v225_v0, %v224_v63 }
 0x190   :  { %v228_v4 = vadd.f32 %v227_v3, %v226_v1 }
 0x192   :  { %v229_v5 = vrot.slane %v228_v4, 4 }
 0x194   :  { %v230_v7 = vadd.f32 %v229_v5, %v228_v4 }
 0x196   :  { %v231_v8 = vrot.slane %v230_v7, 2 }
 0x198   :  { %v232_v11 = vadd.f32 %v231_v8, %v230_v7 }
 0x19a   :  { %v233_v12 = vrot.slane %v232_v11, 1 }
 0x19c   :  { %v234_v14 = vadd.f32 %v233_v12, %v232_v11 }
 0x19e   :  { %v245_v15 = vadd.f32 %v244_v13, %v234_v14 }
 0x1a0   :  { %247 = vst.msk [vmem:[#allocation3] sm:$0x1] %vm246_vm2, %v245_v15 }
 0x1a1   :  { %344 = shalt.err (!%p341_p4)
}
 0x1a2   :  { %s345_s11 = scalar_lea.hbm %s441_s4, 16 }
 0x1a3   :  { %p346_p5 = scmp.ne.s32.totalorder %s441_s4, %s345_s11  ;;  %p349_p6 = scmp.lt.u32.totalorder %s345_s11, %s441_s4 }
 0x1a5   :  { %p351_p7 = pnand %p349_p6, %p346_p5 }
 0x1a7   :  { %354 = shalt.err (!%p351_p7)
}
 0x1a8   :  { %257 = dma.vmem_to_hbm [thread:$0]  %s255_s6, 16, %s441_s4, [#allocation4]  }
 0x1a9   :  { %355 = dma.done.wait [#allocation4], 16  }
 0x1aa   :  { %356 = vsyncadd [#allocation4], 4294967280 }
 0x1ab   :  { %261 = vsyncpa [#allocation4], 1 }

</bundles_post_ra>
